<compile_context>
chip_gen: v5e
topology: v5e:2x2
jax: 0.10.0
libtpu: 0.0.40
codegen_flags: <defaults>
</compile_context>

<pallas_src>
import jax
import jax.numpy as jnp
from jax.experimental import pallas as pl
from jax.experimental.pallas import tpu as pltpu


def _round_up(x, m):
    return (x + m - 1) // m * m


# ----------------------------------------------------------------------------
# Kernel body
# ----------------------------------------------------------------------------
def node_network_kernel(msgs_ref, h_ref,
                        w1m_ref, w1h_ref, b1_ref,
                        w2_ref, b2_ref,
                        w3_ref, b3_ref,
                        w4_ref, b4_ref,
                        out_ref):
    cdt = w1m_ref.dtype                      # MXU compute dtype (bf16 or f32)

    # Cast to the compute dtype *inside* the kernel (VPU work hidden under the
    # msgs DMA) instead of pre-casting in the wrapper, which would add a full
    # extra HBM pass over the dominant msgs tensor.
    msgs = msgs_ref[...].astype(cdt)         # (tn, M*H)
    h = h_ref[...].astype(cdt)               # (tn, H)

    # Layer 1:  cat([h, mean(msgs, 1)], -1) @ W1 + b1
    #        == h @ W1[:H]  +  msgs_flat @ tile(W1[H:]/M, (M,1))
    y = (jnp.dot(msgs, w1m_ref[...], preferred_element_type=jnp.float32)
         + jnp.dot(h, w1h_ref[...], preferred_element_type=jnp.float32)
         + b1_ref[...])
    y = jnp.maximum(y, 0.0).astype(cdt)

    y = jnp.dot(y, w2_ref[...], preferred_element_type=jnp.float32) + b2_ref[...]
    y = jnp.maximum(y, 0.0).astype(cdt)

    y = jnp.dot(y, w3_ref[...], preferred_element_type=jnp.float32) + b3_ref[...]
    y = jnp.maximum(y, 0.0).astype(cdt)

    y = jnp.dot(y, w4_ref[...], preferred_element_type=jnp.float32) + b4_ref[...]
    out_ref[...] = y.astype(out_ref.dtype)


# ----------------------------------------------------------------------------
# Weight preparation (call ONCE, reuse across node_network calls)
# ----------------------------------------------------------------------------
def prepare_weights(params, M, H, compute_dtype=jnp.bfloat16, lane_pad=128):
    """Split / pad / cast the FCN weights for the kernel.

    Returns (w1m, w1h, b1, w2, b2, w3, b3, w4, b4) with
      w1m: (M*H, P1) = tile(W1[H:]/M, (M,1))   (fuses the mailbox mean)
      w1h: (H,   P1) = W1[:H]
      w2 : (P1, P2), w3: (P2, P3), w4: (P3, H)
    Hidden widths P* are zero-padded to multiples of `lane_pad`; padded
    columns get zero weight+bias so their ReLU outputs are exactly zero and
    the padded rows of the next layer are zero as well (bit-exact padding).

    Note (review): w1m/M rounded to bf16 and summed M times slightly amplifies
    rounding vs. mean-then-matmul; this stays well inside the bf16 tolerance.
    """
    (w1, b1), (w2, b2), (w3, b3), (w4, b4) = params
    d1, d2, d3 = w1.shape[1], w2.shape[1], w3.shape[1]
    p1, p2, p3 = (_round_up(d, lane_pad) for d in (d1, d2, d3))

    def pad(a, rows, cols):
        return jnp.pad(a, ((0, rows - a.shape[0]), (0, cols - a.shape[1])))

    w1h = pad(w1[:H, :], H, p1)
    w1m = pad(jnp.tile(w1[H:, :] / M, (M, 1)), M * H, p1)
    b1p = pad(b1, 1, p1)
    w2p = pad(w2, p1, p2)
    b2p = pad(b2, 1, p2)
    w3p = pad(w3, p2, p3)
    b3p = pad(b3, 1, p3)
    w4p = pad(w4, p3, w4.shape[1])
    b4p = b4

    cast = lambda a: a.astype(compute_dtype)
    f32 = lambda a: a.astype(jnp.float32)
    return (cast(w1m), cast(w1h), f32(b1p),
            cast(w2p), f32(b2p),
            cast(w3p), f32(b3p),
            cast(w4p), f32(b4p))


# ----------------------------------------------------------------------------
# Tiling heuristics (generation-aware)
# ----------------------------------------------------------------------------
def _vmem_limits():
    """(tile budget bytes, vmem_limit_bytes) from the actual chip's VMEM."""
    try:
        cap = int(pltpu.get_tpu_info().vmem_capacity_bytes)
    except Exception:
        cap = 64 * 1024 * 1024          # conservative: v7x per-TC size
    limit = min(cap - 16 * 1024 * 1024, (cap * 3) // 4)   # 96 MiB / 48 MiB
    budget = cap // 2 - 4 * 1024 * 1024                    # 60 MiB / 28 MiB
    return max(budget, 8 * 1024 * 1024), max(limit, 16 * 1024 * 1024)


def _choose_tile_n(N, M, H, in_itemsize, vmem_budget_bytes, min_tile=64):
    """Node-row tile: VMEM-sized, multiple of 32, with >=8 (even) grid steps."""
    if N <= min_tile:
        return N                        # single block == full (legal: full dim)

    # VMEM per node-row: double-buffered msgs/h input blocks (native dtype),
    # double-buffered f32 output block, ~4 live f32 activation rows @128 lanes.
    per_node = 2 * (M * H + H) * in_itemsize + 2 * H * 4 + 4 * 128 * 4
    tile = max(min_tile, min(N, vmem_budget_bytes // per_node))
    tile = max(min_tile, (tile // 32) * 32)     # sublane/bf16-friendly multiple

    steps = lambda t: -(-N // t)
    # >=8 steps: pipeline overlap on 1-TC chips, >=4 steps/TC on v7x megacore.
    while tile > min_tile and steps(tile) < 8:
        tile = max(min_tile, ((tile // 2) // 32) * 32)

    # Prefer an even step count so v7x's two TensorCores stay balanced.
    if steps(tile) > 1 and steps(tile) % 2 == 1:
        for t2 in range(tile - 32, 31, -32):
            if steps(t2) % 2 == 0:
                tile = t2
                break
    return tile


# ----------------------------------------------------------------------------
# Wrapper
# ----------------------------------------------------------------------------
def node_network(msgs, h, prepared_weights, *, tile_n=None):
    """msgs: (N, M, H), h: (N, H), prepared_weights from prepare_weights().

    Returns updated h: (N, H) float32.
    """
    N, M, H = msgs.shape
    assert h.shape == (N, H)
    w1m = prepared_weights[0]
    assert w1m.shape[0] == M * H, "prepared weights don't match (M, H)"
    assert prepared_weights[7].shape[1] == H

    # Metadata-only reshape; NO dtype cast here (cast happens in-kernel).
    msgs_flat = msgs.reshape(N, M * H)

    vmem_budget, vmem_limit = _vmem_limits()
    if tile_n is None:
        tile_n = _choose_tile_n(N, M, H, jnp.dtype(msgs.dtype).itemsize,
                                vmem_budget)
    grid_n = pl.cdiv(N, tile_n)          # partial last block handled by Pallas

    def full(a):
        nd = a.ndim
        return pl.BlockSpec(a.shape, lambda i, _nd=nd: (0,) * _nd)

    p1 = prepared_weights[0].shape[1]
    p2 = prepared_weights[3].shape[1]
    p3 = prepared_weights[5].shape[1]
    flops = 2 * N * ((M * H + H) * p1 + p1 * p2 + p2 * p3 + p3 * H)
    bytes_accessed = (msgs_flat.size * msgs_flat.dtype.itemsize
                      + h.size * h.dtype.itemsize
                      + N * H * 4
                      + sum(int(w.size) * w.dtype.itemsize
                            for w in prepared_weights))
    cost = pl.CostEstimate(flops=int(flops), transcendentals=0,
                           bytes_accessed=int(bytes_accessed))

    grid_spec = pltpu.PrefetchScalarGridSpec(
        num_scalar_prefetch=0,
        grid=(grid_n,),
        in_specs=[
            pl.BlockSpec((tile_n, M * H), lambda i: (i, 0)),
            pl.BlockSpec((tile_n, H), lambda i: (i, 0)),
            # Grid-invariant weights/biases (constant block index -> fetched
            # once).  A further A/B candidate is pipeline_mode=pl.Buffered(1)
            # here to drop their second VMEM buffer (~0.3 MiB) on v7x.
        ] + [full(w) for w in prepared_weights],
        out_specs=pl.BlockSpec((tile_n, H), lambda i: (i, 0)),
    )

    return pl.pallas_call(
        node_network_kernel,
        out_shape=jax.ShapeDtypeStruct((N, H), jnp.float32),
        grid_spec=grid_spec,
        compiler_params=pltpu.CompilerParams(
            dimension_semantics=("parallel",),
            vmem_limit_bytes=int(vmem_limit)),
        cost_estimate=cost,
    )(msgs_flat, h, *prepared_weights)


# ----------------------------------------------------------------------------
# Reference & test
# ----------------------------------------------------------------------------
def init_params(key, H):
    """FCN(2H, [3H, 2H, 2H], H). Weights stored as (in, out), biases as (1, out)."""
    dims = [(2 * H, 3 * H), (3 * H, 2 * H), (2 * H, 2 * H), (2 * H, H)]
    params = []
    for (fan_in, fan_out) in dims:
        key, kw, kb = jax.random.split(key, 3)
        bound = 1.0 / jnp.sqrt(fan_in)
        w = jax.random.uniform(kw, (fan_in, fan_out), jnp.float32, -bound, bound)
        b = jax.random.uniform(kb, (1, fan_out), jnp.float32, -bound, bound)
        params.append((w, b))
    return params


def node_network_ref(msgs, h, params):
    agg = jnp.mean(msgs, axis=1)
    x = jnp.concatenate([h, agg], axis=-1)
    (w1, b1), (w2, b2), (w3, b3), (w4, b4) = params
    y = jnp.maximum(x @ w1 + b1, 0.0)
    y = jnp.maximum(y @ w2 + b2, 0.0)
    y = jnp.maximum(y @ w3 + b3, 0.0)
    return y @ w4 + b4


if __name__ == "__main__":
    H = 32        # N_hidden
    M = 8         # messages per node (mailbox depth)
    N = 256       # number of nodes

    key = jax.random.PRNGKey(0)
    k_msgs, k_h, k_params = jax.random.split(key, 3)
    msgs = jax.random.normal(k_msgs, (N, M, H), jnp.float32)
    h = jax.random.normal(k_h, (N, H), jnp.float32)
    params = init_params(k_params, H)

    ref = node_network_ref(msgs, h, params)

    # Weight prep hoisted out of the per-call path (review item): done once.
    weights_f32 = prepare_weights(params, M, H, jnp.float32)
    weights_bf16 = prepare_weights(params, M, H, jnp.bfloat16)

    run = jax.jit(node_network)

    # f32 path: checks the mean-fusion / lane-padding plumbing.
    out_f32 = jax.block_until_ready(run(msgs, h, weights_f32))
    assert out_f32.shape == (N, H)
    assert jnp.allclose(out_f32, ref, atol=2e-3, rtol=2e-3), \
        float(jnp.max(jnp.abs(out_f32 - ref)))

    # Default bf16 compute path (f32 inputs read once, cast in-kernel).
    out_bf16 = jax.block_until_ready(run(msgs, h, weights_bf16))
    assert out_bf16.shape == (N, H)
    assert jnp.allclose(out_bf16, ref, atol=5e-2, rtol=5e-2), \
        float(jnp.max(jnp.abs(out_bf16 - ref)))

    print("KERNEL_OK")
</pallas_src>

<mosaic_0001>
module attributes {stable_mosaic.version = 11 : i64} {
  func.func @node_network_kernel(%arg0: i32, %arg1: memref<64x256xf32, #tpu.memory_space<vmem>>, %arg2: memref<64x32xf32, #tpu.memory_space<vmem>>, %arg3: memref<256x128xf32, #tpu.memory_space<vmem>>, %arg4: memref<32x128xf32, #tpu.memory_space<vmem>>, %arg5: memref<1x128xf32, #tpu.memory_space<vmem>>, %arg6: memref<128x128xf32, #tpu.memory_space<vmem>>, %arg7: memref<1x128xf32, #tpu.memory_space<vmem>>, %arg8: memref<128x128xf32, #tpu.memory_space<vmem>>, %arg9: memref<1x128xf32, #tpu.memory_space<vmem>>, %arg10: memref<128x32xf32, #tpu.memory_space<vmem>>, %arg11: memref<1x32xf32, #tpu.memory_space<vmem>>, %arg12: memref<64x32xf32, #tpu.memory_space<vmem>>) attributes {dimension_semantics = [#tpu.dimension_semantics<parallel>], iteration_bounds = array<i64: 4>, scalar_prefetch = 0 : i64, scratch_operands = 0 : i64, tpu.core_type = #tpu.core_type<tc>, window_params = [{transform_indices = @transform_0, window_bounds = array<i64: 64, 256>}, {transform_indices = @transform_1, window_bounds = array<i64: 64, 32>}, {pipeline_mode = #tpu.pipeline_mode<synchronous>, transform_indices = @transform_2, window_bounds = array<i64: 256, 128>}, {pipeline_mode = #tpu.pipeline_mode<synchronous>, transform_indices = @transform_3, window_bounds = array<i64: 32, 128>}, {pipeline_mode = #tpu.pipeline_mode<synchronous>, transform_indices = @transform_4, window_bounds = array<i64: 1, 128>}, {pipeline_mode = #tpu.pipeline_mode<synchronous>, transform_indices = @transform_5, window_bounds = array<i64: 128, 128>}, {pipeline_mode = #tpu.pipeline_mode<synchronous>, transform_indices = @transform_6, window_bounds = array<i64: 1, 128>}, {pipeline_mode = #tpu.pipeline_mode<synchronous>, transform_indices = @transform_7, window_bounds = array<i64: 128, 128>}, {pipeline_mode = #tpu.pipeline_mode<synchronous>, transform_indices = @transform_8, window_bounds = array<i64: 1, 128>}, {pipeline_mode = #tpu.pipeline_mode<synchronous>, transform_indices = @transform_9, window_bounds = array<i64: 128, 32>}, {pipeline_mode = #tpu.pipeline_mode<synchronous>, transform_indices = @transform_10, window_bounds = array<i64: 1, 32>}, {transform_indices = @transform_11, window_bounds = array<i64: 64, 32>}]} {
    %c0 = arith.constant 0 : index
    %c0_0 = arith.constant 0 : index
    %0 = vector.load %arg1[%c0, %c0_0] : memref<64x256xf32, #tpu.memory_space<vmem>>, vector<64x256xf32>
    %c0_1 = arith.constant 0 : index
    %c0_2 = arith.constant 0 : index
    %1 = vector.load %arg2[%c0_1, %c0_2] : memref<64x32xf32, #tpu.memory_space<vmem>>, vector<64x32xf32>
    %c0_3 = arith.constant 0 : index
    %c0_4 = arith.constant 0 : index
    %2 = vector.load %arg3[%c0_3, %c0_4] : memref<256x128xf32, #tpu.memory_space<vmem>>, vector<256x128xf32>
    %cst = arith.constant dense<0.000000e+00> : vector<64x128xf32>
    %3 = tpu.matmul %0, %2, %cst {dimension_numbers = #tpu.dot_dimension_numbers<[1], [0], [0], [1], [0, 0, 1, 1], [], []>} : vector<64x256xf32>, vector<256x128xf32>, vector<64x128xf32> -> vector<64x128xf32>
    %c0_5 = arith.constant 0 : index
    %c0_6 = arith.constant 0 : index
    %4 = vector.load %arg4[%c0_5, %c0_6] : memref<32x128xf32, #tpu.memory_space<vmem>>, vector<32x128xf32>
    %cst_7 = arith.constant dense<0.000000e+00> : vector<64x128xf32>
    %5 = tpu.matmul %1, %4, %cst_7 {dimension_numbers = #tpu.dot_dimension_numbers<[1], [0], [0], [1], [0, 0, 1, 1], [], []>} : vector<64x32xf32>, vector<32x128xf32>, vector<64x128xf32> -> vector<64x128xf32>
    %6 = arith.addf %3, %5 : vector<64x128xf32>
    %c0_8 = arith.constant 0 : index
    %c0_9 = arith.constant 0 : index
    %7 = vector.load %arg5[%c0_8, %c0_9] : memref<1x128xf32, #tpu.memory_space<vmem>>, vector<1x128xf32>
    %8 = vector.broadcast %7 : vector<1x128xf32> to vector<64x128xf32>
    %9 = arith.addf %6, %8 : vector<64x128xf32>
    %cst_10 = arith.constant 0.000000e+00 : f32
    %10 = vector.broadcast %cst_10 : f32 to vector<64x128xf32>
    %11 = arith.maximumf %9, %10 : vector<64x128xf32>
    %c0_11 = arith.constant 0 : index
    %c0_12 = arith.constant 0 : index
    %12 = vector.load %arg6[%c0_11, %c0_12] : memref<128x128xf32, #tpu.memory_space<vmem>>, vector<128x128xf32>
    %cst_13 = arith.constant dense<0.000000e+00> : vector<64x128xf32>
    %13 = tpu.matmul %11, %12, %cst_13 {dimension_numbers = #tpu.dot_dimension_numbers<[1], [0], [0], [1], [0, 0, 1, 1], [], []>} : vector<64x128xf32>, vector<128x128xf32>, vector<64x128xf32> -> vector<64x128xf32>
    %c0_14 = arith.constant 0 : index
    %c0_15 = arith.constant 0 : index
    %14 = vector.load %arg7[%c0_14, %c0_15] : memref<1x128xf32, #tpu.memory_space<vmem>>, vector<1x128xf32>
    %15 = vector.broadcast %14 : vector<1x128xf32> to vector<64x128xf32>
    %16 = arith.addf %13, %15 : vector<64x128xf32>
    %cst_16 = arith.constant 0.000000e+00 : f32
    %17 = vector.broadcast %cst_16 : f32 to vector<64x128xf32>
    %18 = arith.maximumf %16, %17 : vector<64x128xf32>
    %c0_17 = arith.constant 0 : index
    %c0_18 = arith.constant 0 : index
    %19 = vector.load %arg8[%c0_17, %c0_18] : memref<128x128xf32, #tpu.memory_space<vmem>>, vector<128x128xf32>
    %cst_19 = arith.constant dense<0.000000e+00> : vector<64x128xf32>
    %20 = tpu.matmul %18, %19, %cst_19 {dimension_numbers = #tpu.dot_dimension_numbers<[1], [0], [0], [1], [0, 0, 1, 1], [], []>} : vector<64x128xf32>, vector<128x128xf32>, vector<64x128xf32> -> vector<64x128xf32>
    %c0_20 = arith.constant 0 : index
    %c0_21 = arith.constant 0 : index
    %21 = vector.load %arg9[%c0_20, %c0_21] : memref<1x128xf32, #tpu.memory_space<vmem>>, vector<1x128xf32>
    %22 = vector.broadcast %21 : vector<1x128xf32> to vector<64x128xf32>
    %23 = arith.addf %20, %22 : vector<64x128xf32>
    %cst_22 = arith.constant 0.000000e+00 : f32
    %24 = vector.broadcast %cst_22 : f32 to vector<64x128xf32>
    %25 = arith.maximumf %23, %24 : vector<64x128xf32>
    %c0_23 = arith.constant 0 : index
    %c0_24 = arith.constant 0 : index
    %26 = vector.load %arg10[%c0_23, %c0_24] : memref<128x32xf32, #tpu.memory_space<vmem>>, vector<128x32xf32>
    %cst_25 = arith.constant dense<0.000000e+00> : vector<64x32xf32>
    %27 = tpu.matmul %25, %26, %cst_25 {dimension_numbers = #tpu.dot_dimension_numbers<[1], [0], [0], [1], [0, 0, 1, 1], [], []>} : vector<64x128xf32>, vector<128x32xf32>, vector<64x32xf32> -> vector<64x32xf32>
    %c0_26 = arith.constant 0 : index
    %c0_27 = arith.constant 0 : index
    %28 = vector.load %arg11[%c0_26, %c0_27] : memref<1x32xf32, #tpu.memory_space<vmem>>, vector<1x32xf32>
    %29 = vector.broadcast %28 : vector<1x32xf32> to vector<64x32xf32>
    %30 = arith.addf %27, %29 : vector<64x32xf32>
    %c0_28 = arith.constant 0 : index
    %c0_29 = arith.constant 0 : index
    %31 = vector.load %arg12[%c0_28, %c0_29] : memref<64x32xf32, #tpu.memory_space<vmem>>, vector<64x32xf32>
    tpu.vector_store %arg12[%c0_28, %c0_29], %30 {strides = array<i32>} : memref<64x32xf32, #tpu.memory_space<vmem>>, vector<64x32xf32>,
    return
  }
  func.func @transform_0(%arg0: i32) -> (i32, i32) {
    %c0_i32 = arith.constant 0 : i32
    %c0_i32_0 = arith.constant 0 : i32
    return %arg0, %c0_i32 : i32, i32
  }
  func.func @transform_1(%arg0: i32) -> (i32, i32) {
    %c0_i32 = arith.constant 0 : i32
    %c0_i32_0 = arith.constant 0 : i32
    return %arg0, %c0_i32 : i32, i32
  }
  func.func @transform_2(%arg0: i32) -> (i32, i32) {
    %c0_i32 = arith.constant 0 : i32
    %c0_i32_0 = arith.constant 0 : i32
    %c0_i32_1 = arith.constant 0 : i32
    return %c0_i32, %c0_i32_0 : i32, i32
  }
  func.func @transform_3(%arg0: i32) -> (i32, i32) {
    %c0_i32 = arith.constant 0 : i32
    %c0_i32_0 = arith.constant 0 : i32
    %c0_i32_1 = arith.constant 0 : i32
    return %c0_i32, %c0_i32_0 : i32, i32
  }
  func.func @transform_4(%arg0: i32) -> (i32, i32) {
    %c0_i32 = arith.constant 0 : i32
    %c0_i32_0 = arith.constant 0 : i32
    %c0_i32_1 = arith.constant 0 : i32
    return %c0_i32, %c0_i32_0 : i32, i32
  }
  func.func @transform_5(%arg0: i32) -> (i32, i32) {
    %c0_i32 = arith.constant 0 : i32
    %c0_i32_0 = arith.constant 0 : i32
    %c0_i32_1 = arith.constant 0 : i32
    return %c0_i32, %c0_i32_0 : i32, i32
  }
  func.func @transform_6(%arg0: i32) -> (i32, i32) {
    %c0_i32 = arith.constant 0 : i32
    %c0_i32_0 = arith.constant 0 : i32
    %c0_i32_1 = arith.constant 0 : i32
    return %c0_i32, %c0_i32_0 : i32, i32
  }
  func.func @transform_7(%arg0: i32) -> (i32, i32) {
    %c0_i32 = arith.constant 0 : i32
    %c0_i32_0 = arith.constant 0 : i32
    %c0_i32_1 = arith.constant 0 : i32
    return %c0_i32, %c0_i32_0 : i32, i32
  }
  func.func @transform_8(%arg0: i32) -> (i32, i32) {
    %c0_i32 = arith.constant 0 : i32
    %c0_i32_0 = arith.constant 0 : i32
    %c0_i32_1 = arith.constant 0 : i32
    return %c0_i32, %c0_i32_0 : i32, i32
  }
  func.func @transform_9(%arg0: i32) -> (i32, i32) {
    %c0_i32 = arith.constant 0 : i32
    %c0_i32_0 = arith.constant 0 : i32
    %c0_i32_1 = arith.constant 0 : i32
    return %c0_i32, %c0_i32_0 : i32, i32
  }
  func.func @transform_10(%arg0: i32) -> (i32, i32) {
    %c0_i32 = arith.constant 0 : i32
    %c0_i32_0 = arith.constant 0 : i32
    %c0_i32_1 = arith.constant 0 : i32
    return %c0_i32, %c0_i32_0 : i32, i32
  }
  func.func @transform_11(%arg0: i32) -> (i32, i32) {
    %c0_i32 = arith.constant 0 : i32
    %c0_i32_0 = arith.constant 0 : i32
    return %arg0, %c0_i32 : i32, i32
  }
}

</mosaic_0001>

<bundles_post_ra>
// kernel: node_network.1
= control target key start
LH: loop header
LB: loop body
LE: loop exit
PB: predicated region body
PF: predicated region fallthrough
CT: control target
= control target key end

     0   :  { %s1057_s17 = smov 0   ;;  %s1419_s0 = inlined_call_operand.vmem [shape: f32[256,256], index: 0, kind: input, shape index: {}]   ;;  %s1420_s1 = inlined_call_operand.vmem [shape: f32[256,32], index: 1, kind: input, shape index: {}]   ;;  %s1421_s2 = inlined_call_operand.vmem [shape: f32[256,128], index: 2, kind: input, shape index: {}]   ;;  %s1422_s3 = inlined_call_operand.vmem [shape: f32[32,128], index: 3, kind: input, shape index: {}]   ;;  %s1423_s4 = inlined_call_operand.vmem [shape: f32[1,128], index: 4, kind: input, shape index: {}]   ;;  %s1424_s5 = inlined_call_operand.vmem [shape: f32[128,128], index: 5, kind: input, shape index: {}]   ;;  %s1425_s6 = inlined_call_operand.vmem [shape: f32[1,128], index: 6, kind: input, shape index: {}]   ;;  %s1426_s7 = inlined_call_operand.vmem [shape: f32[128,128], index: 7, kind: input, shape index: {}]   ;;  %s1427_s8 = inlined_call_operand.vmem [shape: f32[1,128], index: 8, kind: input, shape index: {}]   ;;  %s1428_s9 = inlined_call_operand.vmem [shape: f32[128,32], index: 9, kind: input, shape index: {}]   ;;  %s1429_s10 = inlined_call_operand.vmem [shape: f32[1,32], index: 10, kind: input, shape index: {}]   ;;  %s1430_s11 = inlined_call_operand.vmem [shape: f32[256,32], index: 11, kind: output, shape index: {}]  }
   0x1 LB: > { %s918_s18 = sadd.s32 4294967295, %s995_s17   ;;  %p922_p0 = scmp.ge.s32.totalorder %s995_s17, 1  ;;  %s995_s17 = sphi %s1057_s17, %s21_s17  }
   0x2   : > { %p350_p1 = scmp.lt.s32.totalorder %s995_s17, 5 }
   0x4   : > { %p351_p2 = pnand %p922_p0, %p350_p1 }
   0x5   : > { %s923_s23 = sshll.u32 (!%p351_p2), %s918_s18, 3 }
   0x6   : > { %354 = sbr.rel (%p351_p2) target bundleno = 664 (0x298), region = 64  ;;  %p397_p3 = scmp.lt.s32.totalorder (!%p351_p2), %s923_s23, 31 }
   0xb   : > { %v454_v0 = vld [vmem:[%s1421_s2 + $0x78] sm:$0xff]  ;;  %v453_v1 = vld [vmem:[%s1421_s2 + $0x70] sm:$0xff]  ;;  %v452_v2 = vld [vmem:[%s1421_s2 + $0x68] sm:$0xff]  ;;  %s1432_s23 = smov (!%p397_p3, %s923_s23), 31  ;;  %vm475_vm0 = vcmask 261120  }
   0xc   : > { %945 = vmatpush.msra.mxu2 %v454_v0  ;;  %541 = vmatpush.msra.mxu1 %v454_v0  ;;  %v451_v3 = vld [vmem:[%s1421_s2 + $0x60] sm:$0xff]  ;;  %v474_v4 = vld [vmem:[%s1422_s3 + $0x18] sm:$0xff]  ;;  %v473_v5 = vld [vmem:[%s1422_s3 + $0x10] sm:$0xff]  ;;  %s927_s13 = sshll.u32 %s1432_s23, 3  ;;  %s940_s26 = sshll.u32 %s1432_s23, 4 }
   0xd   : > { %941 = vmatpush.msra.mxu3 %v474_v4  ;;  %v450_v6 = vld [vmem:[%s1421_s2 + $0x58] sm:$0xff]  ;;  %v472_v7 = vld [vmem:[%s1422_s3 + $0x8] sm:$0xff]  ;;  %s1097_s21 = scalar_lea.vmem %s1420_s1, %s927_s13  ;;  %512 = vmatpush.msra.mxu0 %v474_v4  ;;  %v449_v8 = vld [vmem:[%s1421_s2 + $0x50] sm:$0xff]  ;;  %s1141_s15 = scalar_lea.vmem %s1419_s0, %s940_s26 }
   0xe   : > { %946 = vmatpush.msra.mxu2 %v453_v1  ;;  %542 = vmatpush.msra.mxu1 %v453_v1  ;;  %v471_v9 = vld [vmem:[%s1422_s3] sm:$0xff]  ;;  %v448_v10 = vld [vmem:[%s1421_s2 + $0x48] sm:$0xff]  ;;  %v446_v13 = vld [vmem:[%s1421_s2 + $0x38] sm:$0xff]  ;;  %s413_s16 = scalar_lea.vmem %s1430_s11, %s927_s13 }
   0xf   : > { %942 = vmatpush.msra.mxu3 %v473_v5  ;;  %513 = vmatpush.msra.mxu0 %v473_v5  ;;  %v435_v11 = vld [vmem:[%s1097_s21 + $0x20] sm:$0xff]  ;;  %v445_v14 = vld [vmem:[%s1421_s2 + $0x30] sm:$0xff]  ;;  %v436_v15 = vld [vmem:[%s1097_s21 + $0x28] sm:$0xff] }
  0x10   : > { %947 = vmatpush.msra.mxu2 %v452_v2  ;;  %543 = vmatpush.msra.mxu1 %v452_v2  ;;  %v447_v12 = vld [vmem:[%s1421_s2 + $0x40] sm:$0xff]  ;;  %v444_v16 = vld [vmem:[%s1421_s2 + $0x28] sm:$0xff]  ;;  %v442_v18 = vld [vmem:[%s1421_s2 + $0x18] sm:$0xff] }
  0x11   : > { %943 = vmatpush.msra.mxu3 %v472_v7  ;;  %514 = vmatpush.msra.mxu0 %v472_v7  ;;  %v443_v17 = vld [vmem:[%s1421_s2 + $0x20] sm:$0xff]  ;;  %v441_v19 = vld [vmem:[%s1421_s2 + $0x10] sm:$0xff]  ;;  %v440_v21 = vld [vmem:[%s1421_s2 + $0x8] sm:$0xff] }
  0x12   : > { %948 = vmatpush.msra.mxu2 %v451_v3  ;;  %544 = vmatpush.msra.mxu1 %v451_v3  ;;  %v437_v20 = vld [vmem:[%s1097_s21 + $0x30] sm:$0xff]  ;;  %v439_v22 = vld [vmem:[%s1421_s2] sm:$0xff]  ;;  %v470_v24 = vld [vmem:[%s1421_s2 + $0xf8] sm:$0xff] }
  0x13   : > { %944 = vmatpush.msra.mxu3 %v471_v9  ;;  %515 = vmatpush.msra.mxu0 %v471_v9  ;;  %v423_v23 = vld [vmem:[%s1141_s15 + $0x40] sm:$0xff]  ;;  %v469_v25 = vld [vmem:[%s1421_s2 + $0xf0] sm:$0xff]  ;;  %v438_v28 = vld [vmem:[%s1097_s21 + $0x38] sm:$0xff] }
  0x14   : > { %949 = vmatpush.msra.mxu2 %v450_v6  ;;  %545 = vmatpush.msra.mxu1 %v450_v6  ;;  %v431_v26 = vld [vmem:[%s1097_s21] sm:$0xff]  ;;  %v468_v29 = vld [vmem:[%s1421_s2 + $0xe8] sm:$0xff]  ;;  %v425_v31 = vld [vmem:[%s1141_s15 + $0x50] sm:$0xff] }
  0x15   : > { %934 = vmatmul.msk.f32.vlgmr.msra.gmra.mxu3 %vm475_vm0, %v435_v11  ;;  %v415_v27 = vld [vmem:[%s1141_s15] sm:$0xff]  ;;  %930 = vmatmul.msk.f32.vlgmr.msra.gmra.mxu0 %vm475_vm0, %v431_v26  ;;  %v466_v32 = vld [vmem:[%s1421_s2 + $0xd8] sm:$0xff]  ;;  %v465_v33 = vld [vmem:[%s1421_s2 + $0xd0] sm:$0xff] }
  0x16   : > { %950 = vmatpush.msra.mxu2 %v449_v8  ;;  %546 = vmatpush.msra.mxu1 %v449_v8  ;;  %v467_v30 = vld [vmem:[%s1421_s2 + $0xe0] sm:$0xff]  ;;  %v432_v34 = vld [vmem:[%s1097_s21 + $0x8] sm:$0xff]  ;;  %v417_v35 = vld [vmem:[%s1141_s15 + $0x10] sm:$0xff] }
  0x17   : > { %v464_v36 = vld [vmem:[%s1421_s2 + $0xc8] sm:$0xff]  ;;  %v463_v37 = vld [vmem:[%s1421_s2 + $0xc0] sm:$0xff]  ;;  %v462_v39 = vld [vmem:[%s1421_s2 + $0xb8] sm:$0xff] }
  0x18   : > { %951 = vmatpush.msra.mxu2 %v448_v10  ;;  %547 = vmatpush.msra.mxu1 %v448_v10  ;;  %v427_v38 = vld [vmem:[%s1141_s15 + $0x60] sm:$0xff]  ;;  %v461_v40 = vld [vmem:[%s1421_s2 + $0xb0] sm:$0xff]  ;;  %v460_v43 = vld [vmem:[%s1421_s2 + $0xa8] sm:$0xff] }
  0x19   : > { %v433_v41 = vld [vmem:[%s1097_s21 + $0x10] sm:$0xff]  ;;  %v419_v42 = vld [vmem:[%s1141_s15 + $0x20] sm:$0xff]  ;;  %v458_v46 = vld [vmem:[%s1421_s2 + $0x98] sm:$0xff] }
  0x1a   : > { %952 = vmatpush.msra.mxu2 %v447_v12  ;;  %548 = vmatpush.msra.mxu1 %v447_v12  ;;  %v459_v44 = vld [vmem:[%s1421_s2 + $0xa0] sm:$0xff]  ;;  %v429_v45 = vld [vmem:[%s1141_s15 + $0x70] sm:$0xff]  ;;  %v434_v48 = vld [vmem:[%s1097_s21 + $0x18] sm:$0xff] }
  0x1b   : > { %v457_v47 = vld [vmem:[%s1421_s2 + $0x90] sm:$0xff]  ;;  %v456_v50 = vld [vmem:[%s1421_s2 + $0x88] sm:$0xff]  ;;  %v455_v51 = vld [vmem:[%s1421_s2 + $0x80] sm:$0xff] }
  0x1c   : > { %953 = vmatpush.msra.mxu2 %v446_v13  ;;  %549 = vmatpush.msra.mxu1 %v446_v13  ;;  %v421_v49 = vld [vmem:[%s1141_s15 + $0x30] sm:$0xff]  ;;  %v416_v52 = vld [vmem:[%s1141_s15 + $0x8] sm:$0xff]  ;;  %v418_v53 = vld [vmem:[%s1141_s15 + $0x18] sm:$0xff] }
  0x1d   : > { %935 = vmatmul.msk.f32.gmra.mxu3 %vm475_vm0, %v436_v15  ;;  %931 = vmatmul.msk.f32.gmra.mxu0 %vm475_vm0, %v432_v34  ;;  %v420_v54 = vld [vmem:[%s1141_s15 + $0x28] sm:$0xff]  ;;  %v422_v55 = vld [vmem:[%s1141_s15 + $0x38] sm:$0xff]  ;;  %v657_v61 = vld [vmem:[%s1424_s5 + $0x70] sm:$0xff] }
  0x1e   : > { %954 = vmatpush.msra.mxu2 %v445_v14  ;;  %550 = vmatpush.msra.mxu1 %v445_v14  ;;  %v424_v56 = vld [vmem:[%s1141_s15 + $0x48] sm:$0xff]  ;;  %v426_v57 = vld [vmem:[%s1141_s15 + $0x58] sm:$0xff]  ;;  %v655_v63 = vld [vmem:[%s1424_s5 + $0x60] sm:$0xff] }
  0x1f   : > { %v428_v58 = vld [vmem:[%s1141_s15 + $0x68] sm:$0xff]  ;;  %v430_v59 = vld [vmem:[%s1141_s15 + $0x78] sm:$0xff]  ;;  %v653_v1 = vld [vmem:[%s1424_s5 + $0x50] sm:$0xff] }
  0x20   : > { %955 = vmatpush.msra.mxu2 %v444_v16  ;;  %551 = vmatpush.msra.mxu1 %v444_v16  ;;  %v658_v60 = vld [vmem:[%s1424_s5 + $0x78] sm:$0xff]  ;;  %v656_v62 = vld [vmem:[%s1424_s5 + $0x68] sm:$0xff]  ;;  %v651_v3 = vld [vmem:[%s1424_s5 + $0x40] sm:$0xff] }
  0x21   : > { %663 = vmatpush.msrb.mxu3 %v658_v60  ;;  %v654_v0 = vld [vmem:[%s1424_s5 + $0x58] sm:$0xff]  ;;  %v652_v2 = vld [vmem:[%s1424_s5 + $0x48] sm:$0xff]  ;;  %v649_v5 = vld [vmem:[%s1424_s5 + $0x30] sm:$0xff] }
  0x22   : > { %956 = vmatpush.msra.mxu2 %v443_v17  ;;  %552 = vmatpush.msra.mxu1 %v443_v17  ;;  %v650_v4 = vld [vmem:[%s1424_s5 + $0x38] sm:$0xff]  ;;  %v648_v6 = vld [vmem:[%s1424_s5 + $0x28] sm:$0xff]  ;;  %v647_v7 = vld [vmem:[%s1424_s5 + $0x20] sm:$0xff] }
  0x23   : > { %664 = vmatpush.msrb.mxu3 %v657_v61  ;;  %v646_v8 = vld [vmem:[%s1424_s5 + $0x18] sm:$0xff]  ;;  %v645_v10 = vld [vmem:[%s1424_s5 + $0x10] sm:$0xff]  ;;  %v644_v11 = vld [vmem:[%s1424_s5 + $0x8] sm:$0xff] }
  0x24   : > { %957 = vmatpush.msra.mxu2 %v442_v18  ;;  %553 = vmatpush.msra.mxu1 %v442_v18  ;;  %v643_v12 = vld [vmem:[%s1424_s5] sm:$0xff]  ;;  %v721_v61 = vld [vmem:[%s1426_s7 + $0x48] sm:$0xff] }
  0x25   : > { %936 = vmatmul.msk.f32.gmra.mxu3 %vm475_vm0, %v437_v20  ;;  %932 = vmatmul.msk.f32.gmra.mxu0 %vm475_vm0, %v433_v41 }
  0x26   : > { %958 = vmatpush.msra.mxu2 %v441_v19  ;;  %554 = vmatpush.msra.mxu1 %v441_v19 }
  0x27   : > { %665 = vmatpush.msrb.mxu3 %v656_v62 }
  0x28   : > { %959 = vmatpush.msra.mxu2 %v440_v21  ;;  %555 = vmatpush.msra.mxu1 %v440_v21  ;;  %v1276_v21 = vld [vmem:[%s1423_s4] ss:$0 sm:$0xff] }
  0x29   : > { %666 = vmatpush.msrb.mxu3 %v655_v63 }
  0x2a   : > { %960 = vmatpush.msra.mxu2 %v439_v22  ;;  %556 = vmatpush.msra.mxu1 %v439_v22 }
  0x2b   : > { %569 = vmatmul.f32.vlgmr.msra.gmra.mxu2 %v423_v23  ;;  %557 = vmatmul.f32.vlgmr.msra.gmra.mxu1 %v415_v27 }
  0x2c   : > { %582 = vmatpush.msrb.mxu2 %v470_v24  ;;  %667 = vmatpush.msrb.mxu3 %v654_v0  ;;  %v720_v0 = vld [vmem:[%s1426_s7 + $0x40] sm:$0xff] }
  0x2d   : > { %937 = vmatmul.msk.f32.gmra.mxu3 %vm475_vm0, %v438_v28  ;;  %933 = vmatmul.msk.f32.gmra.mxu0 %vm475_vm0, %v434_v48  ;;  %v726_v48 = vld [vmem:[%s1426_s7 + $0x70] sm:$0xff] }
  0x2e   : > { %583 = vmatpush.msrb.mxu2 %v469_v25  ;;  %668 = vmatpush.msrb.mxu3 %v653_v1 }
  0x30   : > { %584 = vmatpush.msrb.mxu2 %v468_v29  ;;  %669 = vmatpush.msrb.mxu3 %v652_v2  ;;  %v719_v2 = vld [vmem:[%s1426_s7 + $0x38] sm:$0xff] }
  0x32   : > { %585 = vmatpush.msrb.mxu2 %v467_v30  ;;  %670 = vmatpush.msrb.mxu3 %v651_v3 }
  0x33   : > { %572 = vmatmul.f32.gmra.mxu2 %v425_v31  ;;  %560 = vmatmul.f32.gmra.mxu1 %v417_v35 }
  0x34   : > { %586 = vmatpush.msrb.mxu2 %v466_v32  ;;  %671 = vmatpush.msrb.mxu3 %v650_v4  ;;  %v718_v4 = vld [vmem:[%s1426_s7 + $0x30] sm:$0xff] }
  0x36   : > { %587 = vmatpush.msrb.mxu2 %v465_v33  ;;  %672 = vmatpush.msrb.mxu3 %v649_v5 }
  0x38   : > { %588 = vmatpush.msrb.mxu2 %v464_v36  ;;  %673 = vmatpush.msrb.mxu3 %v648_v6 }
  0x3a   : > { %589 = vmatpush.msrb.mxu2 %v463_v37  ;;  %674 = vmatpush.msrb.mxu3 %v647_v7  ;;  %v717_v7 = vld [vmem:[%s1426_s7 + $0x28] sm:$0xff] }
  0x3b   : > { %575 = vmatmul.f32.gmra.mxu2 %v427_v38  ;;  %563 = vmatmul.f32.gmra.mxu1 %v419_v42 }
  0x3c   : > { %590 = vmatpush.msrb.mxu2 %v462_v39  ;;  %675 = vmatpush.msrb.mxu3 %v646_v8 }
  0x3e   : > { %591 = vmatpush.msrb.mxu2 %v461_v40  ;;  %676 = vmatpush.msrb.mxu3 %v645_v10 }
  0x40   : > { %592 = vmatpush.msrb.mxu2 %v460_v43  ;;  %677 = vmatpush.msrb.mxu3 %v644_v11 }
  0x42   : > { %593 = vmatpush.msrb.mxu2 %v459_v44  ;;  %678 = vmatpush.msrb.mxu3 %v643_v12  ;;  %v715_v12 = vld [vmem:[%s1426_s7 + $0x18] sm:$0xff] }
  0x43   : > { %578 = vmatmul.f32.gmra.mxu2 %v429_v45  ;;  %566 = vmatmul.f32.gmra.mxu1 %v421_v49 }
  0x44   : > { %594 = vmatpush.msrb.mxu2 %v458_v46 }
  0x46   : > { %595 = vmatpush.msrb.mxu2 %v457_v47  ;;  %v727_v47 = vld [vmem:[%s1426_s7 + $0x78] sm:$0xff] }
  0x47   : > { %732 = vmatpush.msrb.mxu0 %v727_v47 }
  0x48   : > { %596 = vmatpush.msrb.mxu2 %v456_v50 }
  0x49   : > { %733 = vmatpush.msrb.mxu0 %v726_v48  ;;  %v788_v48 = vld [vmem:[%s1428_s9 + $0x38] sm:$0xff] }
  0x4a   : > { %597 = vmatpush.msrb.mxu2 %v455_v51 }
  0x4b   : > { %598 = vmatmul.f32.vlgmr.msrb.gmra.mxu2 %v416_v52  ;;  %v725_v52 = vld [vmem:[%s1426_s7 + $0x68] sm:$0xff] }
  0x4c   : > { %734 = vmatpush.msrb.mxu0 %v725_v52 }
  0x53   : > { %601 = vmatmul.f32.gmra.mxu2 %v418_v53 }
  0x5b   : > { %604 = vmatmul.f32.gmra.mxu2 %v420_v54  ;;  %v724_v54 = vld [vmem:[%s1426_s7 + $0x60] sm:$0xff] }
  0x5c   : > { %735 = vmatpush.msrb.mxu0 %v724_v54 }
  0x63   : > { %607 = vmatmul.f32.gmra.mxu2 %v422_v55 }
  0x6b   : > { %610 = vmatmul.f32.gmra.mxu2 %v424_v56  ;;  %v723_v56 = vld [vmem:[%s1426_s7 + $0x58] sm:$0xff] }
  0x6c   : > { %736 = vmatpush.msrb.mxu0 %v723_v56 }
  0x73   : > { %613 = vmatmul.f32.gmra.mxu2 %v426_v57 }
  0x7b   : > { %616 = vmatmul.f32.gmra.mxu2 %v428_v58  ;;  %v722_v58 = vld [vmem:[%s1426_s7 + $0x50] sm:$0xff] }
  0x7c   : > { %737 = vmatpush.msrb.mxu0 %v722_v58 }
  0x7e   : > { %738 = vmatpush.msrb.mxu0 %v721_v61  ;;  %v781_v61 = vld [vmem:[%s1428_s9] sm:$0xff] }
  0x80   : > { %739 = vmatpush.msrb.mxu0 %v720_v0 }
  0x82   : > { %740 = vmatpush.msrb.mxu0 %v719_v2 }
  0x83   : > { %619 = vmatmul.f32.gmra.mxu2 %v430_v59 }
  0x84   : > { %741 = vmatpush.msrb.mxu0 %v718_v4 }
  0x86   : > { %742 = vmatpush.msrb.mxu0 %v717_v7 }
  0x92   : > { %v517_v15 = vpop.f32.mrf.mxu0 }
  0x98   : > { %v529_v41 = vpop.f32.mrf.mxu3 }
  0x9a   : > { %v520_v19 = vpop.f32.mrf.mxu0 }
  0xa0   : > { %v532_v49 = vpop.f32.mrf.mxu3 }
  0xa2   : > { %v523_v27 = vpop.f32.mrf.mxu0 }
  0xa8   : > { %v558_v16 = vpop.f32.mrf.mxu1  ;;  %v535_v62 = vpop.f32.mrf.mxu3 }
  0xa9   : > { %v559_v18 = vadd.f32 %v558_v16, %v517_v15 }
  0xaa   : > { %v526_v36 = vpop.f32.mrf.mxu0 }
  0xae   : > { %v570_v9 = vpop.f32.mrf.mxu2 }
  0xaf   : > { %v571_v46 = vadd.f32 %v570_v9, %v529_v41  ;;  %v716_v9 = vld [vmem:[%s1426_s7 + $0x20] sm:$0xff]  ;;  %v792_v41 = vld [vmem:[%s1428_s9 + $0x58] sm:$0xff] }
  0xb0   : > { %v561_v20 = vpop.f32.mrf.mxu1  ;;  %v538_v10 = vpop.f32.mrf.mxu3  ;;  %743 = vmatpush.msrb.mxu0 %v716_v9 }
  0xb1   : > { %v562_v26 = vadd.f32 %v561_v20, %v520_v19  ;;  %v713_v20 = vld [vmem:[%s1426_s7 + $0x8] sm:$0xff] }
  0xb2   : > { %744 = vmatpush.msrb.mxu0 %v715_v12 }
  0xb6   : > { %v573_v13 = vpop.f32.mrf.mxu2 }
  0xb7   : > { %v574_v57 = vadd.f32 %v573_v13, %v532_v49  ;;  %v787_v49 = vld [vmem:[%s1428_s9 + $0x30] sm:$0xff] }
  0xb8   : > { %v564_v29 = vpop.f32.mrf.mxu1 }
  0xb9   : > { %v565_v32 = vadd.f32 %v564_v29, %v523_v27 }
  0xbe   : > { %v1269_v14 = vpop.f32.mrf.mxu2 }
  0xbf   : > { %v577_v3 = vadd.f32 %v1269_v14, %v535_v62  ;;  %v714_v14 = vld [vmem:[%s1426_s7 + $0x10] sm:$0xff]  ;;  %v987_v62 = vld [vmem:[%s1427_s8] ss:$0 sm:$0xff] }
  0xc0   : > { %v567_v37 = vpop.f32.mrf.mxu1  ;;  %745 = vmatpush.msrb.mxu0 %v714_v14 }
  0xc1   : > { %v568_v39 = vadd.f32 %v567_v37, %v526_v36  ;;  %v794_v36 = vld [vmem:[%s1428_s9 + $0x68] sm:$0xff] }
  0xc2   : > { %746 = vmatpush.msrb.mxu0 %v713_v20 }
  0xc6   : > { %v1271_v17 = vpop.f32.mrf.mxu2 }
  0xc7   : > { %v580_v13 = vadd.f32 %v1271_v17, %v538_v10  ;;  %v712_v17 = vld [vmem:[%s1426_s7] sm:$0xff] }
  0xc8   : > { %747 = vmatpush.msrb.mxu0 %v712_v17 }
  0xce   : > { %v599_v22 = vpop.f32.mrf.mxu2 }
  0xcf   : > { %v600_v23 = vadd.f32 %v599_v22, %v559_v18  ;;  %v1339_v22 = vld [vmem:[%s1425_s6] ss:$0 sm:$0xff] }
  0xd1   : > { %v627_v24 = vadd.f32 %v1276_v21, %v600_v23 }
  0xd3   : > { %v635_v25 = vmax.f32 %v627_v24, 0.0 }
  0xd5   : > { %679 = vmatmul.f32.vlgmr.msrb.gmra.mxu3 %v635_v25 }
  0xd6   : > { %v602_v28 = vpop.f32.mrf.mxu2 }
  0xd7   : > { %v603_v30 = vadd.f32 %v602_v28, %v562_v26 }
  0xd9   : > { %v628_v31 = vadd.f32 %v1276_v21, %v603_v30 }
  0xdb   : > { %v636_v33 = vmax.f32 %v628_v31, 0.0 }
  0xdd   : > { %682 = vmatmul.f32.gmra.mxu3 %v636_v33 }
  0xde   : > { %v605_v34 = vpop.f32.mrf.mxu2 }
  0xdf   : > { %v606_v35 = vadd.f32 %v605_v34, %v565_v32  ;;  %v796_v34 = vld [vmem:[%s1428_s9 + $0x78] sm:$0xff] }
  0xe0   : > { %801 = vmatpush.msra.mxu0 %v796_v34  ;;  %961 = vmatpush.msrb.mxu1 %v796_v34 }
  0xe1   : > { %v629_v38 = vadd.f32 %v1276_v21, %v606_v35  ;;  %v795_v35 = vld [vmem:[%s1428_s9 + $0x70] sm:$0xff] }
  0xe2   : > { %802 = vmatpush.msra.mxu0 %v795_v35  ;;  %962 = vmatpush.msrb.mxu1 %v795_v35 }
  0xe3   : > { %v637_v40 = vmax.f32 %v629_v38, 0.0 }
  0xe4   : > { %803 = vmatpush.msra.mxu0 %v794_v36  ;;  %963 = vmatpush.msrb.mxu1 %v794_v36 }
  0xe5   : > { %685 = vmatmul.f32.gmra.mxu3 %v637_v40 }
  0xe6   : > { %v608_v42 = vpop.f32.mrf.mxu2 }
  0xe7   : > { %v609_v43 = vadd.f32 %v608_v42, %v568_v39  ;;  %v793_v39 = vld [vmem:[%s1428_s9 + $0x60] sm:$0xff]  ;;  %v791_v42 = vld [vmem:[%s1428_s9 + $0x50] sm:$0xff] }
  0xe8   : > { %804 = vmatpush.msra.mxu0 %v793_v39  ;;  %964 = vmatpush.msrb.mxu1 %v793_v39 }
  0xe9   : > { %v630_v44 = vadd.f32 %v1276_v21, %v609_v43  ;;  %v790_v43 = vld [vmem:[%s1428_s9 + $0x48] sm:$0xff] }
  0xea   : > { %805 = vmatpush.msra.mxu0 %v792_v41  ;;  %965 = vmatpush.msrb.mxu1 %v792_v41 }
  0xeb   : > { %v638_v45 = vmax.f32 %v630_v44, 0.0 }
  0xec   : > { %806 = vmatpush.msra.mxu0 %v791_v42  ;;  %966 = vmatpush.msrb.mxu1 %v791_v42 }
  0xed   : > { %688 = vmatmul.f32.gmra.mxu3 %v638_v45 }
  0xee   : > { %v611_v50 = vpop.f32.mrf.mxu2  ;;  %807 = vmatpush.msra.mxu0 %v790_v43  ;;  %967 = vmatpush.msrb.mxu1 %v790_v43 }
  0xef   : > { %v612_v51 = vadd.f32 %v611_v50, %v571_v46  ;;  %v789_v46 = vld [vmem:[%s1428_s9 + $0x40] sm:$0xff]  ;;  %v786_v50 = vld [vmem:[%s1428_s9 + $0x28] sm:$0xff] }
  0xf0   : > { %808 = vmatpush.msra.mxu0 %v789_v46  ;;  %968 = vmatpush.msrb.mxu1 %v789_v46 }
  0xf1   : > { %v631_v53 = vadd.f32 %v1276_v21, %v612_v51 }
  0xf2   : > { %809 = vmatpush.msra.mxu0 %v788_v48  ;;  %969 = vmatpush.msrb.mxu1 %v788_v48 }
  0xf3   : > { %v639_v55 = vmax.f32 %v631_v53, 0.0  ;;  %v785_v53 = vld [vmem:[%s1428_s9 + $0x20] sm:$0xff] }
  0xf4   : > { %810 = vmatpush.msra.mxu0 %v787_v49  ;;  %970 = vmatpush.msrb.mxu1 %v787_v49 }
  0xf5   : > { %691 = vmatmul.f32.gmra.mxu3 %v639_v55  ;;  %v784_v55 = vld [vmem:[%s1428_s9 + $0x18] sm:$0xff] }
  0xf6   : > { %v614_v59 = vpop.f32.mrf.mxu2  ;;  %811 = vmatpush.msra.mxu0 %v786_v50  ;;  %971 = vmatpush.msrb.mxu1 %v786_v50 }
  0xf7   : > { %v615_v60 = vadd.f32 %v614_v59, %v574_v57  ;;  %v783_v59 = vld [vmem:[%s1428_s9 + $0x10] sm:$0xff] }
  0xf8   : > { %812 = vmatpush.msra.mxu0 %v785_v53  ;;  %972 = vmatpush.msrb.mxu1 %v785_v53 }
  0xf9   : > { %v632_v63 = vadd.f32 %v1276_v21, %v615_v60  ;;  %v782_v60 = vld [vmem:[%s1428_s9 + $0x8] sm:$0xff] }
  0xfa   : > { %813 = vmatpush.msra.mxu0 %v784_v55  ;;  %973 = vmatpush.msrb.mxu1 %v784_v55 }
  0xfb   : > { %v640_v1 = vmax.f32 %v632_v63, 0.0 }
  0xfc   : > { %814 = vmatpush.msra.mxu0 %v783_v59  ;;  %974 = vmatpush.msrb.mxu1 %v783_v59 }
  0xfd   : > { %694 = vmatmul.f32.gmra.mxu3 %v640_v1 }
  0xfe   : > { %v617_v5 = vpop.f32.mrf.mxu2  ;;  %815 = vmatpush.msra.mxu0 %v782_v60  ;;  %975 = vmatpush.msrb.mxu1 %v782_v60 }
  0xff   : > { %v618_v6 = vadd.f32 %v617_v5, %v577_v3 }
 0x100   : > { %816 = vmatpush.msra.mxu0 %v781_v61  ;;  %976 = vmatpush.msrb.mxu1 %v781_v61 }
 0x101   : > { %v633_v8 = vadd.f32 %v1276_v21, %v618_v6 }
 0x103   : > { %v641_v11 = vmax.f32 %v633_v8, 0.0 }
 0x105   : > { %697 = vmatmul.f32.gmra.mxu3 %v641_v11 }
 0x106   : > { %v620_v15 = vpop.f32.mrf.mxu2 }
 0x107   : > { %v621_v16 = vadd.f32 %v620_v15, %v580_v13 }
 0x109   : > { %v634_v18 = vadd.f32 %v1276_v21, %v621_v16 }
 0x10b   : > { %v642_v19 = vmax.f32 %v634_v18, 0.0 }
 0x10d   : > { %700 = vmatmul.f32.gmra.mxu3 %v642_v19 }
 0x158   : > { %v680_v23 = vpop.f32.mrf.mxu3 }
 0x159   : > { %v681_v21 = vadd.f32 %v1339_v22, %v680_v23 }
 0x15b   : > { %v704_v24 = vmax.f32 %v681_v21, 0.0  ;;  %v988_v21 = vld [vmem:[%s1429_s10] ss:$0 sm:$0xff] }
 0x15d   : > { %748 = vmatmul.f32.vlgmr.msrb.gmra.mxu0 %v704_v24 }
 0x160   : > { %v683_v25 = vpop.f32.mrf.mxu3 }
 0x161   : > { %v684_v26 = vadd.f32 %v1339_v22, %v683_v25 }
 0x163   : > { %v705_v27 = vmax.f32 %v684_v26, 0.0 }
 0x165   : > { %751 = vmatmul.f32.gmra.mxu0 %v705_v27 }
 0x168   : > { %v686_v28 = vpop.f32.mrf.mxu3 }
 0x169   : > { %v687_v29 = vadd.f32 %v1339_v22, %v686_v28 }
 0x16b   : > { %v706_v30 = vmax.f32 %v687_v29, 0.0 }
 0x16d   : > { %754 = vmatmul.f32.gmra.mxu0 %v706_v30 }
 0x170   : > { %v689_v31 = vpop.f32.mrf.mxu3 }
 0x171   : > { %v690_v32 = vadd.f32 %v1339_v22, %v689_v31 }
 0x173   : > { %v707_v33 = vmax.f32 %v690_v32, 0.0 }
 0x175   : > { %757 = vmatmul.f32.gmra.mxu0 %v707_v33 }
 0x178   : > { %v692_v37 = vpop.f32.mrf.mxu3 }
 0x179   : > { %v693_v38 = vadd.f32 %v1339_v22, %v692_v37 }
 0x17b   : > { %v708_v40 = vmax.f32 %v693_v38, 0.0 }
 0x17d   : > { %760 = vmatmul.f32.gmra.mxu0 %v708_v40 }
 0x180   : > { %v695_v44 = vpop.f32.mrf.mxu3 }
 0x181   : > { %v696_v45 = vadd.f32 %v1339_v22, %v695_v44 }
 0x183   : > { %v709_v47 = vmax.f32 %v696_v45, 0.0 }
 0x185   : > { %763 = vmatmul.f32.gmra.mxu0 %v709_v47 }
 0x188   : > { %v698_v51 = vpop.f32.mrf.mxu3 }
 0x189   : > { %v699_v52 = vadd.f32 %v1339_v22, %v698_v51 }
 0x18b   : > { %v710_v54 = vmax.f32 %v699_v52, 0.0 }
 0x18d   : > { %766 = vmatmul.f32.gmra.mxu0 %v710_v54 }
 0x190   : > { %v701_v56 = vpop.f32.mrf.mxu3 }
 0x191   : > { %v702_v57 = vadd.f32 %v1339_v22, %v701_v56 }
 0x193   : > { %v711_v58 = vmax.f32 %v702_v57, 0.0 }
 0x195   : > { %769 = vmatmul.f32.gmra.mxu0 %v711_v58 }
 0x1da   : > { %v749_v63 = vpop.f32.mrf.mxu0 }
 0x1db   : > { %v750_v0 = vadd.f32 %v987_v62, %v749_v63 }
 0x1dd   : > { %v773_v1 = vmax.f32 %v750_v0, 0.0 }
 0x1df   : > { %817 = vmatmul.f32.vlgmr.msra.gmra.mxu0 %v773_v1 }
 0x1e2   : > { %v752_v2 = vpop.f32.mrf.mxu0 }
 0x1e3   : > { %v753_v3 = vadd.f32 %v987_v62, %v752_v2 }
 0x1e5   : > { %v774_v4 = vmax.f32 %v753_v3, 0.0 }
 0x1e7   : > { %820 = vmatmul.f32.vlgmr.msrb.gmra.mxu1 %v774_v4 }
 0x1ea   : > { %v755_v5 = vpop.f32.mrf.mxu0 }
 0x1eb   : > { %v756_v6 = vadd.f32 %v987_v62, %v755_v5 }
 0x1ed   : > { %v775_v7 = vmax.f32 %v756_v6, 0.0 }
 0x1ef   : > { %823 = vmatmul.f32.gmra.mxu1 %v775_v7 }
 0x1f2   : > { %v758_v8 = vpop.f32.mrf.mxu0 }
 0x1f3   : > { %v759_v9 = vadd.f32 %v987_v62, %v758_v8 }
 0x1f5   : > { %v776_v10 = vmax.f32 %v759_v9, 0.0 }
 0x1f7   : > { %826 = vmatmul.f32.gmra.mxu1 %v776_v10 }
 0x1fa   : > { %v761_v11 = vpop.f32.mrf.mxu0 }
 0x1fb   : > { %v762_v12 = vadd.f32 %v987_v62, %v761_v11 }
 0x1fd   : > { %v777_v13 = vmax.f32 %v762_v12, 0.0 }
 0x1ff   : > { %829 = vmatmul.f32.gmra.mxu1 %v777_v13 }
 0x202   : > { %v764_v14 = vpop.f32.mrf.mxu0 }
 0x203   : > { %v765_v15 = vadd.f32 %v987_v62, %v764_v14 }
 0x205   : > { %v778_v16 = vmax.f32 %v765_v15, 0.0 }
 0x207   : > { %832 = vmatmul.f32.gmra.mxu1 %v778_v16 }
 0x20a   : > { %v767_v18 = vpop.f32.mrf.mxu0 }
 0x20b   : > { %v768_v19 = vadd.f32 %v987_v62, %v767_v18 }
 0x20d   : > { %v779_v20 = vmax.f32 %v768_v19, 0.0 }
 0x20f   : > { %835 = vmatmul.f32.gmra.mxu1 %v779_v20 }
 0x212   : > { %v770_v17 = vpop.f32.mrf.mxu0 }
 0x213   : > { %v771_v22 = vadd.f32 %v987_v62, %v770_v17 }
 0x215   : > { %v780_v23 = vmax.f32 %v771_v22, 0.0 }
 0x217   : > { %838 = vmatmul.f32.gmra.mxu1 %v780_v23 }
 0x25c   : > { %v818_v24 = vpop.f32.mrf.mxu0 }
 0x25d   : > { %v819_v25 = vadd.f32 %v988_v21, %v818_v24 }
 0x25f   : > { %842 = vst.msk [vmem:[%s413_s16] sm:$0xff] %vm475_vm0, %v819_v25 }
 0x264   : > { %v821_v26 = vpop.f32.mrf.mxu1 }
 0x265   : > { %v822_v27 = vadd.f32 %v988_v21, %v821_v26 }
 0x267   : > { %843 = vst.msk [vmem:[%s413_s16 + $0x8] sm:$0xff] %vm475_vm0, %v822_v27 }
 0x26c   : > { %v824_v28 = vpop.f32.mrf.mxu1 }
 0x26d   : > { %v825_v29 = vadd.f32 %v988_v21, %v824_v28 }
 0x26f   : > { %844 = vst.msk [vmem:[%s413_s16 + $0x10] sm:$0xff] %vm475_vm0, %v825_v29 }
 0x274   : > { %v827_v30 = vpop.f32.mrf.mxu1 }
 0x275   : > { %v828_v31 = vadd.f32 %v988_v21, %v827_v30 }
 0x277   : > { %845 = vst.msk [vmem:[%s413_s16 + $0x18] sm:$0xff] %vm475_vm0, %v828_v31 }
 0x27c   : > { %v830_v32 = vpop.f32.mrf.mxu1 }
 0x27d   : > { %v831_v33 = vadd.f32 %v988_v21, %v830_v32 }
 0x27f   : > { %846 = vst.msk [vmem:[%s413_s16 + $0x20] sm:$0xff] %vm475_vm0, %v831_v33 }
 0x284   : > { %v833_v34 = vpop.f32.mrf.mxu1 }
 0x285   : > { %v834_v35 = vadd.f32 %v988_v21, %v833_v34 }
 0x287   : > { %847 = vst.msk [vmem:[%s413_s16 + $0x28] sm:$0xff] %vm475_vm0, %v834_v35 }
 0x28c   : > { %v836_v36 = vpop.f32.mrf.mxu1 }
 0x28d   : > { %v837_v37 = vadd.f32 %v988_v21, %v836_v36 }
 0x28f   : > { %848 = vst.msk [vmem:[%s413_s16 + $0x30] sm:$0xff] %vm475_vm0, %v837_v37 }
 0x294   : > { %v839_v38 = vpop.f32.mrf.mxu1 }
 0x295   : > { %v840_v39 = vadd.f32 %v988_v21, %v839_v38 }
 0x297   : > { %849 = vst.msk [vmem:[%s413_s16 + $0x38] sm:$0xff] %vm475_vm0, %v840_v39 }
 0x298 PF: > { %s21_s17 = sadd.s32 1, %s995_s17  }
 0x299   : > { %p18_p4 = scmp.ge.s32.totalorder %s21_s17, 6  }
 0x29b   :  { %20 = sbr.rel (!%p18_p4) target bundleno = 1 (0x1), region = 97 }

</bundles_post_ra>
